<compile_context>
chip_gen: v5e
topology: v5e:2x2
jax: 0.10.0
libtpu: 0.0.40
codegen_flags: <defaults>
</compile_context>

<pallas_src>
import jax
import jax.numpy as jnp
from jax import lax
from jax.experimental import pallas as pl
from jax.experimental.pallas import tpu as pltpu

# ---- model hyper-params (from Model.__init__) --------------------------------
IN_CH = 1
OUT_CH = 25
K = 5
STRIDE = 2
PAD = 1
IMG = 28                                     # implied by Linear(4225, 10)
OH = (IMG + 2 * PAD - K) // STRIDE + 1       # 13
OW = OH                                      # 13
S = OH * OW                                  # 169 spatial positions
TAPS = IN_CH * K * K                         # 25 patch features
TAPS_PAD = 32                                # taps padded 25 -> 32
CH_PAD = 32                                  # out-channels padded 25 -> 32
NUM_CLASSES = 10
CLS_PAD = 128                                # classes padded 10 -> 128 (lane-dense)
FLAT = OUT_CH * S                            # 4225

SPG = 4                                      # spatial positions per MXU row group
S_PAD = 176                                  # spatial padded 169 -> 176 (44*4)
GROUPS = S_PAD // SPG                        # 44
ROW = SPG * TAPS_PAD                         # 128 (== SPG * CH_PAD)

SELU_ALPHA = 1.6732632423543772
SELU_SCALE = 1.0507009873554805


def _round_up(n, m):
    return ((n + m - 1) // m) * m


def _selu(x):
    # exp only ever sees the non-positive branch -> no overflow in dead lanes
    return SELU_SCALE * jnp.where(
        x > 0.0, x, SELU_ALPHA * (jnp.exp(jnp.minimum(x, 0.0)) - 1.0))


# ---- fused kernel: conv (block-diag matmul) + SELU + linear + softmax ---------
def fused_forward_kernel(p_ref, wcb_ref, bcb_ref, wl_ref, bl_ref, o_ref):
    # p_ref  : (GROUPS, bt, ROW)      bf16 patches: 4 spatial x 32 taps per row
    # wcb_ref: (ROW, ROW)             bf16 block-diagonal conv weight
    # bcb_ref: (1, ROW)               f32 conv bias tiled per spatial slot
    # wl_ref : (GROUPS, ROW, CLS_PAD) bf16 linear weight, K folded over (s, c)
    # bl_ref : (1, CLS_PAD)           f32 linear bias (-1e30 on padded classes)
    # o_ref  : (bt, CLS_PAD)          f32 softmax probabilities
    bt = o_ref.shape[0]
    wcb = wcb_ref[...]
    bcb = bcb_ref[...]

    def body(q, acc):
        pq = p_ref[q]                                                 # (bt, 128) bf16
        hq = jnp.dot(pq, wcb, preferred_element_type=jnp.float32)     # conv pre-act
        hq = _selu(hq + bcb)                                          # (bt, 128) f32
        acc = acc + jnp.dot(hq.astype(jnp.bfloat16), wl_ref[q],
                            preferred_element_type=jnp.float32)       # (bt, 128)
        return acc

    logits = lax.fori_loop(0, GROUPS, body,
                           jnp.zeros((bt, CLS_PAD), jnp.float32))
    logits = logits + bl_ref[...]          # padded classes -> -1e30 -> exp == 0

    m = jnp.max(logits, axis=-1, keepdims=True)
    e = jnp.exp(logits - m)
    o_ref[...] = e / jnp.sum(e, axis=-1, keepdims=True)


# ---- forward wrapper -----------------------------------------------------------
def model_forward(x, conv_w, conv_b, lin_w, lin_b):
    B = x.shape[0]
    bt = min(128, _round_up(B, 16))          # bf16 sublane packing needs mult of 16
    b_pad = _round_up(B, bt)

    # im2col, batch-major (no minor-dim-25 transpose); tap order = (kh, kw)
    xp = jnp.pad(x[:, 0], ((0, 0), (PAD, PAD), (PAD, PAD)))            # (B, 30, 30)
    cols = [xp[:, kh:kh + STRIDE * (OH - 1) + 1:STRIDE,
                  kw:kw + STRIDE * (OW - 1) + 1:STRIDE]
            for kh in range(K) for kw in range(K)]                     # 25 x (B,13,13)
    pat = jnp.stack(cols, axis=-1).reshape(B, S, TAPS)                 # (B, 169, 25)
    pat = jnp.pad(pat, ((0, b_pad - B), (0, S_PAD - S), (0, TAPS_PAD - TAPS)))
    pat = pat.astype(jnp.bfloat16).reshape(b_pad, GROUPS, ROW)         # free reshape
    pat = jnp.transpose(pat, (1, 0, 2))                                # (44, b_pad, 128)

    # Conv weight -> [tap, channel], padded to (32, 32), 4-way block-diagonal.
    wc = jnp.pad(conv_w.reshape(OUT_CH, TAPS).T,
                 ((0, TAPS_PAD - TAPS), (0, CH_PAD - OUT_CH)))         # (32, 32)
    wcb = jnp.kron(jnp.eye(SPG, dtype=wc.dtype), wc).astype(jnp.bfloat16)  # (128, 128)
    bcb = jnp.tile(jnp.pad(conv_b, (0, CH_PAD - OUT_CH)), SPG) \
             .reshape(1, ROW).astype(jnp.float32)

    # Linear weight permuted to (spatial, channel, class), then folded so each
    # group's K dim is (4 spatial x 32 channels) = 128; padded rows/cols are 0.
    wl = jnp.transpose(lin_w.reshape(NUM_CLASSES, OUT_CH, S), (2, 1, 0))   # (169,25,10)
    wl = jnp.pad(wl, ((0, S_PAD - S), (0, CH_PAD - OUT_CH),
                      (0, CLS_PAD - NUM_CLASSES)))                         # (176,32,128)
    wl = wl.reshape(GROUPS, ROW, CLS_PAD).astype(jnp.bfloat16)             # (44,128,128)
    bl = jnp.full((1, CLS_PAD), -1e30, jnp.float32).at[0, :NUM_CLASSES].set(lin_b)

    out = pl.pallas_call(
        fused_forward_kernel,
        out_shape=jax.ShapeDtypeStruct((b_pad, CLS_PAD), jnp.float32),
        grid=(b_pad // bt,),
        in_specs=[
            pl.BlockSpec((GROUPS, bt, ROW), lambda i: (0, i, 0)),          # patches
            pl.BlockSpec((ROW, ROW), lambda i: (0, 0)),                    # conv W (resident)
            pl.BlockSpec((1, ROW), lambda i: (0, 0)),                      # conv b (resident)
            pl.BlockSpec((GROUPS, ROW, CLS_PAD), lambda i: (0, 0, 0)),     # linear W (resident)
            pl.BlockSpec((1, CLS_PAD), lambda i: (0, 0)),                  # linear b (resident)
        ],
        out_specs=pl.BlockSpec((bt, CLS_PAD), lambda i: (i, 0)),
        compiler_params=pltpu.CompilerParams(
            dimension_semantics=("parallel",)),
    )(pat, wcb, bcb, wl, bl)
    return out[:B, :NUM_CLASSES]


# ---- pure-JAX reference (PyTorch-equivalent, f32) ------------------------------
def reference_forward(x, conv_w, conv_b, lin_w, lin_b):
    y = lax.conv_general_dilated(
        x, conv_w, window_strides=(STRIDE, STRIDE),
        padding=((PAD, PAD), (PAD, PAD)),
        dimension_numbers=('NCHW', 'OIHW', 'NCHW'))
    y = y + conv_b[None, :, None, None]
    y = SELU_SCALE * jnp.where(y > 0.0, y,
                               SELU_ALPHA * (jnp.exp(jnp.minimum(y, 0.0)) - 1.0))
    f = y.reshape(y.shape[0], -1)
    logits = f @ lin_w.T + lin_b[None, :]
    return jax.nn.softmax(logits, axis=1)


if __name__ == "__main__":
    key = jax.random.PRNGKey(0)
    k_x, k_cw, k_cb, k_lw, k_lb = jax.random.split(key, 5)

    B = 2
    x = jax.random.normal(k_x, (B, IN_CH, IMG, IMG), dtype=jnp.float32)

    # deterministic synthetic parameters (shapes from Model.__init__)
    conv_w = 0.05 * jax.random.normal(k_cw, (OUT_CH, IN_CH, K, K), dtype=jnp.float32)
    conv_b = 0.05 * jax.random.normal(k_cb, (OUT_CH,), dtype=jnp.float32)
    lin_w = 0.02 * jax.random.normal(k_lw, (NUM_CLASSES, FLAT), dtype=jnp.float32)
    lin_b = 0.02 * jax.random.normal(k_lb, (NUM_CLASSES,), dtype=jnp.float32)

    fwd = jax.jit(model_forward)
    pred = fwd(x, conv_w, conv_b, lin_w, lin_b)
    jax.block_until_ready(pred)

    assert pred.shape == (B, NUM_CLASSES)
    assert bool(jnp.all(jnp.isfinite(pred)))
    # exact softmax divide -> rows sum to 1 tightly
    assert bool(jnp.allclose(jnp.sum(pred, axis=1), 1.0, atol=1e-3))
    # match the f32 PyTorch-equivalent reference (bf16 matmul operands -> 5e-3)
    ref = reference_forward(x, conv_w, conv_b, lin_w, lin_b)
    assert bool(jnp.allclose(pred, ref, atol=5e-3, rtol=5e-3))
    assert bool(jnp.all(jnp.argmax(pred, axis=1) == jnp.argmax(ref, axis=1)))

    print("KERNEL_OK")
</pallas_src>

<mosaic_0001>
module attributes {stable_mosaic.version = 11 : i64} {
  func.func @fused_forward_kernel(%arg0: i32, %arg1: memref<44x16x128xbf16, #tpu.memory_space<vmem>>, %arg2: memref<128x128xbf16, #tpu.memory_space<vmem>>, %arg3: memref<1x128xf32, #tpu.memory_space<vmem>>, %arg4: memref<44x128x128xbf16, #tpu.memory_space<vmem>>, %arg5: memref<1x128xf32, #tpu.memory_space<vmem>>, %arg6: memref<16x128xf32, #tpu.memory_space<vmem>>) attributes {dimension_semantics = [#tpu.dimension_semantics<parallel>], iteration_bounds = array<i64: 1>, scalar_prefetch = 0 : i64, scratch_operands = 0 : i64, tpu.core_type = #tpu.core_type<tc>, window_params = [{transform_indices = @transform_0, window_bounds = array<i64: 44, 16, 128>}, {pipeline_mode = #tpu.pipeline_mode<synchronous>, transform_indices = @transform_1, window_bounds = array<i64: 128, 128>}, {pipeline_mode = #tpu.pipeline_mode<synchronous>, transform_indices = @transform_2, window_bounds = array<i64: 1, 128>}, {pipeline_mode = #tpu.pipeline_mode<synchronous>, transform_indices = @transform_3, window_bounds = array<i64: 44, 128, 128>}, {pipeline_mode = #tpu.pipeline_mode<synchronous>, transform_indices = @transform_4, window_bounds = array<i64: 1, 128>}, {transform_indices = @transform_5, window_bounds = array<i64: 16, 128>}]} {
    %c0 = arith.constant 0 : index
    %c0_0 = arith.constant 0 : index
    %0 = vector.load %arg2[%c0, %c0_0] : memref<128x128xbf16, #tpu.memory_space<vmem>>, vector<128x128xbf16>
    %c0_1 = arith.constant 0 : index
    %c0_2 = arith.constant 0 : index
    %1 = vector.load %arg3[%c0_1, %c0_2] : memref<1x128xf32, #tpu.memory_space<vmem>>, vector<1x128xf32>
    %cst = arith.constant 0.000000e+00 : f32
    %2 = vector.broadcast %cst : f32 to vector<16x128xf32>
    %c0_i32 = arith.constant 0 : i32
    %c44_i32 = arith.constant 44 : i32
    %3 = arith.addi %c0_i32, %c44_i32 : i32
    %c1_i32 = arith.constant 1 : i32
    %4 = scf.for %arg7 = %c0_i32 to %3 step %c1_i32 iter_args(%arg8 = %2) -> (vector<16x128xf32>)  : i32 {
      %18 = arith.index_cast %arg7 : i32 to index
      %c0_10 = arith.constant 0 : index
      %c0_11 = arith.constant 0 : index
      %19 = vector.load %arg1[%18, %c0_10, %c0_11] : memref<44x16x128xbf16, #tpu.memory_space<vmem>>, vector<1x16x128xbf16>
      %20 = vector.shape_cast %19 : vector<1x16x128xbf16> to vector<16x128xbf16>
      %cst_12 = arith.constant dense<0.000000e+00> : vector<16x128xf32>
      %21 = tpu.matmul %20, %0, %cst_12 {dimension_numbers = #tpu.dot_dimension_numbers<[1], [0], [0], [1], [0, 0, 1, 1], [], []>} : vector<16x128xbf16>, vector<128x128xbf16>, vector<16x128xf32> -> vector<16x128xf32>
      %22 = vector.broadcast %1 : vector<1x128xf32> to vector<16x128xf32>
      %23 = arith.addf %21, %22 : vector<16x128xf32>
      %cst_13 = arith.constant 0.000000e+00 : f32
      %24 = vector.broadcast %cst_13 : f32 to vector<16x128xf32>
      %25 = arith.cmpf ogt, %23, %24 : vector<16x128xf32>
      %cst_14 = arith.constant 0.000000e+00 : f32
      %26 = vector.broadcast %cst_14 : f32 to vector<16x128xf32>
      %27 = arith.minimumf %23, %26 : vector<16x128xf32>
      %28 = math.exp %27 : vector<16x128xf32>
      %cst_15 = arith.constant 1.000000e+00 : f32
      %29 = vector.broadcast %cst_15 : f32 to vector<16x128xf32>
      %30 = arith.subf %28, %29 : vector<16x128xf32>
      %cst_16 = arith.constant 1.67326319 : f32
      %31 = vector.broadcast %cst_16 : f32 to vector<16x128xf32>
      %32 = arith.mulf %31, %30 : vector<16x128xf32>
      %33 = arith.select %25, %23, %32 : vector<16x128xi1>, vector<16x128xf32>
      %cst_17 = arith.constant 1.05070102 : f32
      %34 = vector.broadcast %cst_17 : f32 to vector<16x128xf32>
      %35 = arith.mulf %34, %33 : vector<16x128xf32>
      %36 = arith.truncf %35 : vector<16x128xf32> to vector<16x128xbf16>
      %37 = arith.index_cast %arg7 : i32 to index
      %c0_18 = arith.constant 0 : index
      %c0_19 = arith.constant 0 : index
      %38 = vector.load %arg4[%37, %c0_18, %c0_19] : memref<44x128x128xbf16, #tpu.memory_space<vmem>>, vector<1x128x128xbf16>
      %39 = vector.shape_cast %38 : vector<1x128x128xbf16> to vector<128x128xbf16>
      %cst_20 = arith.constant dense<0.000000e+00> : vector<16x128xf32>
      %40 = tpu.matmul %36, %39, %cst_20 {dimension_numbers = #tpu.dot_dimension_numbers<[1], [0], [0], [1], [0, 0, 1, 1], [], []>} : vector<16x128xbf16>, vector<128x128xbf16>, vector<16x128xf32> -> vector<16x128xf32>
      %41 = arith.addf %arg8, %40 : vector<16x128xf32>
      scf.yield %41 : vector<16x128xf32>
    }
    %c44_i32_3 = arith.constant 44 : i32
    %c0_4 = arith.constant 0 : index
    %c0_5 = arith.constant 0 : index
    %5 = vector.load %arg5[%c0_4, %c0_5] : memref<1x128xf32, #tpu.memory_space<vmem>>, vector<1x128xf32>
    %6 = vector.broadcast %5 : vector<1x128xf32> to vector<16x128xf32>
    %7 = arith.addf %4, %6 : vector<16x128xf32>
    %cst_6 = arith.constant dense<0xFF800000> : vector<16xf32>
    %8 = vector.multi_reduction <maximumf>, %7, %cst_6 [1] : vector<16x128xf32> to vector<16xf32>
    %9 = vector.shape_cast %8 : vector<16xf32> to vector<16x1xf32>
    %10 = vector.broadcast %9 : vector<16x1xf32> to vector<16x128xf32>
    %11 = arith.subf %7, %10 : vector<16x128xf32>
    %12 = math.exp %11 : vector<16x128xf32>
    %cst_7 = arith.constant dense<0.000000e+00> : vector<16xf32>
    %13 = vector.multi_reduction <add>, %12, %cst_7 [1] : vector<16x128xf32> to vector<16xf32>
    %14 = vector.shape_cast %13 : vector<16xf32> to vector<16x1xf32>
    %15 = vector.broadcast %14 : vector<16x1xf32> to vector<16x128xf32>
    %16 = arith.divf %12, %15 : vector<16x128xf32>
    %c0_8 = arith.constant 0 : index
    %c0_9 = arith.constant 0 : index
    %17 = vector.load %arg6[%c0_8, %c0_9] : memref<16x128xf32, #tpu.memory_space<vmem>>, vector<16x128xf32>
    tpu.vector_store %arg6[%c0_8, %c0_9], %16 {strides = array<i32>} : memref<16x128xf32, #tpu.memory_space<vmem>>, vector<16x128xf32>,
    return
  }
  func.func @transform_0(%arg0: i32) -> (i32, i32, i32) {
    %c0_i32 = arith.constant 0 : i32
    %c0_i32_0 = arith.constant 0 : i32
    %c0_i32_1 = arith.constant 0 : i32
    return %c0_i32, %arg0, %c0_i32_0 : i32, i32, i32
  }
  func.func @transform_1(%arg0: i32) -> (i32, i32) {
    %c0_i32 = arith.constant 0 : i32
    %c0_i32_0 = arith.constant 0 : i32
    %c0_i32_1 = arith.constant 0 : i32
    return %c0_i32, %c0_i32_0 : i32, i32
  }
  func.func @transform_2(%arg0: i32) -> (i32, i32) {
    %c0_i32 = arith.constant 0 : i32
    %c0_i32_0 = arith.constant 0 : i32
    %c0_i32_1 = arith.constant 0 : i32
    return %c0_i32, %c0_i32_0 : i32, i32
  }
  func.func @transform_3(%arg0: i32) -> (i32, i32, i32) {
    %c0_i32 = arith.constant 0 : i32
    %c0_i32_0 = arith.constant 0 : i32
    %c0_i32_1 = arith.constant 0 : i32
    %c0_i32_2 = arith.constant 0 : i32
    return %c0_i32, %c0_i32_0, %c0_i32_1 : i32, i32, i32
  }
  func.func @transform_4(%arg0: i32) -> (i32, i32) {
    %c0_i32 = arith.constant 0 : i32
    %c0_i32_0 = arith.constant 0 : i32
    %c0_i32_1 = arith.constant 0 : i32
    return %c0_i32, %c0_i32_0 : i32, i32
  }
  func.func @transform_5(%arg0: i32) -> (i32, i32) {
    %c0_i32 = arith.constant 0 : i32
    %c0_i32_0 = arith.constant 0 : i32
    return %arg0, %c0_i32 : i32, i32
  }
}

</mosaic_0001>

<bundles_post_ra>
// kernel: tile.8
= control target key start
LH: loop header
LB: loop body
LE: loop exit
PB: predicated region body
PF: predicated region fallthrough
CT: control target
= control target key end

     0   :  { %s22_s0 = inlined_call_operand.vmem [shape: f32[32], index: 0, kind: input, shape index: {}]   ;;  %s23_s1 = inlined_call_operand.vmem [shape: f32[4,32], index: 1, kind: output, shape index: {}]  }
   0x1   :  { %v4_v0 = vld [vmem:[%s22_s0] ss:$0 sm:$0xff] }
   0x2   :  { %5 = vst [vmem:[%s23_s1] sm:$0xf] %v4_v0 }

// kernel: tile.9
= control target key start
LH: loop header
LB: loop body
LE: loop exit
PB: predicated region body
PF: predicated region fallthrough
CT: control target
= control target key end

     0   :  { %s37_s8 = smov 32   ;;  %s38_s9 = smov 64   ;;  %vm7_vm0 = vcmask 261120   ;;  %vm13_vm1 = vcmask 1048320   ;;  %vm19_vm2 = vcmask 785920   ;;  %vm25_vm3 = vcmask 523520   ;;  %s55_s0 = inlined_call_operand.vmem [shape: f32[4,32], index: 0, kind: input, shape index: {}]   ;;  %s56_s1 = inlined_call_operand.vmem [shape: f32[1,128], index: 1, kind: output, shape index: {}]  }
   0x1   :  { %v4_v0 = vld [vmem:[%s55_s0] sm:$0xf]  ;;  %s36_s0 = smov 96  }
   0x2   :  { %5 = vst [vmem:[#allocation1] sm:$0xf] %v4_v0 }
   0x9   :  { %v10_v1 = vld [vmem:[#allocation1 + $0x3] sm:$0x1]   ;;  %v22_v2 = vld [vmem:[#allocation1 + $0x1] sm:$0x1]   ;;  %v16_v3 = vld [vmem:[#allocation1 + $0x2] sm:$0x1]  }
   0xa   :  { %11 = vrot.lane.b32.xlu0 %v10_v1, %s36_s0  ;;  %23 = vrot.lane.b32.xlu1 %v22_v2, %s37_s8  ;;  %v6_v4 = vld [vmem:[#allocation1] sm:$0x1]  }
   0xb   :  { %8 = vst.msk [vmem:[#allocation0] sm:$0x1] %vm7_vm0, %v6_v4  }
  0x12   :  { %17 = vrot.lane.b32.xlu0 %v16_v3, %s38_s9 }
  0x7c   :  { %v12_v5 = vpop.permute.xlu0 %11   ;;  %v24_v6 = vpop.permute.xlu1 %23  }
  0x7d   :  { %14 = vst.msk [vmem:[#allocation0] sm:$0x1] %vm13_vm1, %v12_v5  }
  0x84   :  { %v18_v7 = vpop.permute.xlu0 %17  }
  0x85   :  { %20 = vst.msk [vmem:[#allocation0] sm:$0x1] %vm19_vm2, %v18_v7  }
  0x86   :  { %26 = vst.msk [vmem:[#allocation0] sm:$0x1] %vm25_vm3, %v24_v6  }
  0x8d   :  { %v29_v8 = vld [vmem:[#allocation0] sm:$0x1] }
  0x8e   :  { %32 = vst [vmem:[%s56_s1] sm:$0x1] %v29_v8 }

// kernel: model_forward.1
= control target key start
LH: loop header
LB: loop body
LE: loop exit
PB: predicated region body
PF: predicated region fallthrough
CT: control target
= control target key end

     0   :  { %v561_v17 = vmov 0.0   ;;  %v563_v18 = vmov 0.0   ;;  %s565_s27 = smov 0   ;;  %s619_s0 = inlined_call_operand.vmem [shape: bf16[44,16,128], index: 0, kind: input, shape index: {}]   ;;  %s620_s1 = inlined_call_operand.vmem [shape: bf16[128,128], index: 1, kind: input, shape index: {}]   ;;  %s621_s3 = inlined_call_operand.vmem [shape: bf16[44,128,128], index: 3, kind: input, shape index: {}]   ;;  %s622_s4 = inlined_call_operand.vmem [shape: f32[1,128], index: 4, kind: input, shape index: {}]   ;;  %s623_s5 = inlined_call_operand.vmem [shape: f32[16,128], index: 5, kind: output, shape index: {}]   ;;  %s624_s2 = inlined_call_operand.vmem [shape: f32[1,128], index: 2, kind: input, shape index: {}]  }
   0x1   :  { %v479_v0 = vld [vmem:[%s620_s1] sm:$0xf]  ;;  %v484_v1 = vld [vmem:[%s620_s1] sm:$0xf0]  ;;  %v489_v2 = vld [vmem:[%s620_s1 + $0x8] sm:$0xf] }
   0x2   :  { %v494_v3 = vld [vmem:[%s620_s1 + $0x8] sm:$0xf0]  ;;  %v499_v4 = vld [vmem:[%s620_s1 + $0x10] sm:$0xf]  ;;  %v504_v5 = vld [vmem:[%s620_s1 + $0x10] sm:$0xf0] }
   0x3   :  { %v509_v6 = vld [vmem:[%s620_s1 + $0x18] sm:$0xf]  ;;  %v514_v7 = vld [vmem:[%s620_s1 + $0x18] sm:$0xf0]  ;;  %v519_v8 = vld [vmem:[%s620_s1 + $0x20] sm:$0xf] }
   0x4   :  { %v524_v9 = vld [vmem:[%s620_s1 + $0x20] sm:$0xf0]  ;;  %v529_v10 = vld [vmem:[%s620_s1 + $0x28] sm:$0xf]  ;;  %v534_v11 = vld [vmem:[%s620_s1 + $0x28] sm:$0xf0] }
   0x5   :  { %v539_v12 = vld [vmem:[%s620_s1 + $0x30] sm:$0xf]  ;;  %v544_v13 = vld [vmem:[%s620_s1 + $0x30] sm:$0xf0]  ;;  %v549_v14 = vld [vmem:[%s620_s1 + $0x38] sm:$0xf] }
   0x6   :  { %v554_v15 = vld [vmem:[%s620_s1 + $0x38] sm:$0xf0]  ;;  %v559_v16 = vld [vmem:[%s624_s2] sm:$0x1] }
   0x7 LB: > { %v329_v19 = vor.u32 %v554_v15, %v549_v14  ;;  %v325_v20 = vor.u32 %v544_v13, %v539_v12  ;;  %v321_v21 = vor.u32 %v534_v11, %v529_v10  ;;  %v317_v22 = vor.u32 %v524_v9, %v519_v8  ;;  %s374_s1 = sshll.u32 %s444_s27, 3  ;;  %s376_s30 = sshll.u32 %s444_s27, 6  ;;  %s444_s27 = sphi %s565_s27, %s42_s27   ;;  %v440_v18 = vphi %v563_v18, %v626_v18   ;;  %v436_v17 = vphi %v561_v17, %v625_v17  }
   0x8   : > { %v313_v23 = vor.u32 %v514_v7, %v509_v6  ;;  %v309_v24 = vor.u32 %v504_v5, %v499_v4  ;;  %v305_v25 = vor.u32 %v494_v3, %v489_v2  ;;  %v301_v26 = vor.u32 %v484_v1, %v479_v0  ;;  %s47_s29 = scalar_lea.vmem %s619_s0, %s374_s1  ;;  %s140_s8 = scalar_lea.vmem %s621_s3, %s376_s30 }
   0x9   : > { %107 = vmatpush.bf16.msra.mxu0 %v329_v19  ;;  %v375_v27 = vld [vmem:[%s47_s29] sm:$0xff]  ;;  %v384_v28 = vld [vmem:[%s140_s8 + $0x38] sm:$0xff]  ;;  %v383_v29 = vld [vmem:[%s140_s8 + $0x30] sm:$0xff]  ;;  %v51_v36 = vperm.slane %v559_v16, 0  ;;  %s42_s27 = sadd.s32 1, %s444_s27  }
   0xa   : > { %205 = vmatpush.bf16.msra.mxu1 %v384_v28  ;;  %v382_v30 = vld [vmem:[%s140_s8 + $0x28] sm:$0xff]  ;;  %v381_v31 = vld [vmem:[%s140_s8 + $0x20] sm:$0xff]  ;;  %v380_v32 = vld [vmem:[%s140_s8 + $0x18] sm:$0xff]  ;;  %p39_p0 = scmp.ge.s32.totalorder %s42_s27, 44  }
   0xb   : > { %v379_v33 = vld [vmem:[%s140_s8 + $0x10] sm:$0xff]  ;;  %v378_v34 = vld [vmem:[%s140_s8 + $0x8] sm:$0xff]  ;;  %v377_v35 = vld [vmem:[%s140_s8] sm:$0xff] }
   0xc   :  { %v413_v60 = vld [vmem:[%s622_s4] ss:$0 sm:$0xff] (%p39_p0) }
   0xd   : > { %108 = vmatpush.bf16.msra.mxu0 %v325_v20 }
   0xe   : > { %206 = vmatpush.bf16.msra.mxu1 %v383_v29 }
  0x11   : > { %109 = vmatpush.bf16.msra.mxu0 %v321_v21 }
  0x12   : > { %207 = vmatpush.bf16.msra.mxu1 %v382_v30 }
  0x15   : > { %110 = vmatpush.bf16.msra.mxu0 %v317_v22 }
  0x16   : > { %208 = vmatpush.bf16.msra.mxu1 %v381_v31 }
  0x19   : > { %111 = vmatpush.bf16.msra.mxu0 %v313_v23 }
  0x1a   : > { %209 = vmatpush.bf16.msra.mxu1 %v380_v32 }
  0x1d   : > { %112 = vmatpush.bf16.msra.mxu0 %v309_v24 }
  0x1e   : > { %210 = vmatpush.bf16.msra.mxu1 %v379_v33 }
  0x21   : > { %113 = vmatpush.bf16.msra.mxu0 %v305_v25 }
  0x22   : > { %211 = vmatpush.bf16.msra.mxu1 %v378_v34 }
  0x25   : > { %114 = vmatpush.bf16.msra.mxu0 %v301_v26 }
  0x26   : > { %212 = vmatpush.bf16.msra.mxu1 %v377_v35 }
  0x28   : > { %115 = vmatmul.bf16.vlgmr.msra.gmra.mxu0 %v375_v27 }
  0xa5   : > { %v116_v37 = vpop.f32.mrf.mxu0 }
  0xa6   : > { %v117_v38 = vadd.f32 %v116_v37, %v51_v36 }
  0xa8   : > { %v123_v39 = vmin.f32 %v117_v38, 0.0  ;;  %vm121_vm0 = vcmp.gt.f32.partialorder %v117_v38, 0.0 }
  0xaa   : > { %v125_v40 = vmul.f32 1.442695, %v123_v39 }
  0xac   : > { %409 = vpow2.f32 %v125_v40 }
  0xad   : > { %v118_v41 = vpop.f32.mrf.mxu0 }
  0xae   : > { %v119_v42 = vadd.f32 %v118_v41, %v51_v36 }
  0xb0   : > { %v124_v43 = vmin.f32 %v119_v42, 0.0  ;;  %vm122_vm1 = vcmp.gt.f32.partialorder %v119_v42, 0.0 }
  0xb2   : > { %v410_v44 = vpop.eup %409  ;;  %v127_v45 = vmul.f32 1.442695, %v124_v43 }
  0xb3   : > { %v330_v46 = vadd.f32 -1.0, %v410_v44 }
  0xb4   : > { %411 = vpow2.f32 %v127_v45 }
  0xb5   : > { %v131_v47 = vmul.f32 1.6732632, %v330_v46 }
  0xb7   : > { %v133_v51 = vsel %vm121_vm0, %v117_v38, %v131_v47 }
  0xb8   : > { %v135_v53 = vmul.f32 1.050701, %v133_v51 }
  0xba   : > { %v412_v48 = vpop.eup %411 }
  0xbb   : > { %v331_v49 = vadd.f32 -1.0, %v412_v48 }
  0xbd   : > { %v132_v50 = vmul.f32 1.6732632, %v331_v49 }
  0xbf   : > { %v134_v52 = vsel %vm122_vm1, %v119_v42, %v132_v50 }
  0xc0   : > { %v136_v54 = vmul.f32 1.050701, %v134_v52 }
  0xc2   : > { %v137_v55 = vpack.c.bf16 %v136_v54, %v135_v53 }
  0xc4   : > { %213 = vmatmul.bf16.vlgmr.msra.gmra.mxu1 %v137_v55 }
 0x141   : > { %v214_v56 = vpop.f32.mrf.mxu1 }
 0x142   : > { %v219_v57 = vadd.f32 %v440_v18, %v214_v56  }
 0x144   : > { %v626_v18 = vmov %v219_v57  ;;  %v225_v61 = vadd.f32 (%p39_p0), %v413_v60, %v219_v57 }
 0x146   :  { %227 = vmax.xlane.f32.xlu0 (%p39_p0), %v225_v61 }
 0x148   :  { %41 = sbr.rel (!%p39_p0) target bundleno = 7 (0x7), region = 49 }
 0x149   : > { %v216_v58 = vpop.f32.mrf.mxu1 }
 0x14a   : > { %v220_v59 = vadd.f32 %v436_v17, %v216_v58  }
 0x14c   : > { %v625_v17 = vmov %v220_v59  ;;  %v226_v62 = vadd.f32 (%p39_p0), %v413_v60, %v220_v59 }
 0x14e   :  { %229 = vmax.xlane.f32.xlu0 %v226_v62 }
 0x1b9   :  { %v228_v63 = vpop.xlane.xlu0 %227 }
 0x1ba   :  { %v231_v18 = vsub.f32 %v225_v61, %v228_v63 }
 0x1bc   :  { %v233_v19 = vmul.f32 1.442695, %v231_v18 }
 0x1be   :  { %414 = vpow2.f32 %v233_v19 }
 0x1c1   :  { %v230_v20 = vpop.xlane.xlu0 %229 }
 0x1c2   :  { %v232_v21 = vsub.f32 %v226_v62, %v230_v20 }
 0x1c4   :  { %v415_v22 = vpop.eup %414  ;;  %v235_v23 = vmul.f32 1.442695, %v232_v21 }
 0x1c5   :  { %237 = vadd.xlane.f32.xlu1 %v415_v22 }
 0x1c6   :  { %416 = vpow2.f32 %v235_v23 }
 0x1cc   :  { %v417_v24 = vpop.eup %416 }
 0x1cd   :  { %239 = vadd.xlane.f32.xlu1 %v417_v24 }
 0x238   :  { %v238_v0 = vpop.xlane.xlu1 %237 }
 0x239   :  { %418 = vrcp.f32 %v238_v0  ;;  %v252_v5 = vand.u32 2147483648, %v238_v0  ;;  %v250_v7 = vand.u32 2147483647, %v238_v0  ;;  %vm246_vm3 = vweird.f32 %v238_v0 }
 0x23b   :  { %v253_v10 = vor.u32 1.1754944e-38, %v252_v5  ;;  %vm251_vm5 = vcmp.eq.f32.partialorder %v250_v7, 8.507059e+37 }
 0x23f   :  { %v419_v1 = vpop.eup %418 }
 0x240   :  { %v242_v2 = vmul.f32 %v419_v1, %v238_v0  ;;  %v240_v3 = vpop.xlane.xlu1 %239  ;;  %vm247_vm2 = vweird.f32 %v419_v1 }
 0x241   :  { %420 = vrcp.f32 %v240_v3  ;;  %vm248_vm4 = vmor %vm246_vm3, %vm247_vm2  ;;  %v267_v16 = vand.u32 2147483648, %v240_v3  ;;  %v265_v25 = vand.u32 2147483647, %v240_v3  ;;  %vm261_vm7 = vweird.f32 %v240_v3 }
 0x242   :  { %v243_v4 = vsub.f32 1.0, %v242_v2 }
 0x243   :  { %v268_v27 = vor.u32 1.1754944e-38, %v267_v16  ;;  %vm266_vm9 = vcmp.eq.f32.partialorder %v265_v25, 8.507059e+37 }
 0x244   :  { %v244_v6 = vmul.f32 %v419_v1, %v243_v4 }
 0x246   :  { %v245_v8 = vadd.f32 %v419_v1, %v244_v6 }
 0x247   :  { %v421_v9 = vpop.eup %420 }
 0x248   :  { %v249_v11 = vsel %vm248_vm4, %v419_v1, %v245_v8  ;;  %v257_v12 = vmul.f32 %v421_v9, %v240_v3  ;;  %vm262_vm6 = vweird.f32 %v421_v9 }
 0x249   :  { %v254_v13 = vsel %vm251_vm5, %v253_v10, %v249_v11  ;;  %vm263_vm8 = vmor %vm261_vm7, %vm262_vm6 }
 0x24a   :  { %v255_v14 = vmul.f32 %v415_v22, %v254_v13  ;;  %v258_v15 = vsub.f32 1.0, %v257_v12 }
 0x24c   :  { %271 = vst [vmem:[%s623_s5] sm:$0xff] %v255_v14  ;;  %v259_v17 = vmul.f32 %v421_v9, %v258_v15 }
 0x24e   :  { %v260_v26 = vadd.f32 %v421_v9, %v259_v17 }
 0x250   :  { %v264_v28 = vsel %vm263_vm8, %v421_v9, %v260_v26 }
 0x251   :  { %v269_v29 = vsel %vm266_vm9, %v268_v27, %v264_v28 }
 0x252   :  { %v270_v30 = vmul.f32 %v417_v24, %v269_v29 }
 0x254   :  { %272 = vst [vmem:[%s623_s5 + $0x8] sm:$0xff] %v270_v30 }

</bundles_post_ra>
